<compile_context>
chip_gen: v7x
topology: tpu7x:2x2x1
jax: 0.10.0
libtpu: 0.0.40
codegen_flags: <defaults>
</compile_context>

<pallas_src>
import jax
import jax.numpy as jnp
from jax.experimental import pallas as pl
from jax.experimental.pallas import tpu as pltpu


def _round_up(x, m):
    return (x + m - 1) // m * m


def prefix_mlp_kernel(x_ref, w1_ref, b1_ref, w2_ref, b2_ref, o_ref, h_ref):
    # x_ref:  (tm, H)   bf16  one row tile of flattened prefix embeddings
    # w1_ref: (H, P)    bf16  resident across the whole grid
    # b1_ref: (1, P)    f32
    # w2_ref: (P, tn)   bf16  one O-tile of the second-layer weight
    # b2_ref: (1, tn)   f32
    # o_ref:  (tm, tn)  f32
    # h_ref:  (tm, P)   f32 VMEM scratch: tanh(x @ W1 + b1) for this row tile
    @pl.when(pl.program_id(1) == 0)
    def _():
        h = jnp.dot(x_ref[...], w1_ref[...], preferred_element_type=jnp.float32)
        h_ref[...] = jnp.tanh(h + b1_ref[...])

    h_lo = h_ref[...].astype(w2_ref.dtype)  # bf16 for the MXU, f32 accumulate
    o = jnp.dot(h_lo, w2_ref[...], preferred_element_type=jnp.float32) + b2_ref[...]
    o_ref[...] = o.astype(o_ref.dtype)


def prefix_encoder_mlp(x2d, w1, b1, w2, b2, *, tm_max=256, tn_max=1024,
                       matmul_dtype=jnp.bfloat16):
    """x2d: (M, H) -> (M, O) float32, O = w2.shape[1].

    Handles arbitrary M (pads rows to the tile) and tiles the output dim so W2
    is streamed in (P, tn) slabs instead of being fully VMEM-resident.
    """
    M, H = x2d.shape
    P = w1.shape[1]
    O = w2.shape[1]

    # Row tile: single block for small M, otherwise MXU-shaped 256-row tiles.
    tm = min(tm_max, _round_up(M, 8))
    # O tile: lane-dense multiple of 128.
    tn = min(tn_max, _round_up(O, 128))
    M_pad = _round_up(M, tm)
    O_pad = _round_up(O, tn)

    # bf16 matmul inputs (native MXU path, half the HBM weight traffic);
    # biases stay f32 and the bias-add / tanh are done in f32 inside the kernel.
    x_p = x2d.astype(matmul_dtype)
    if M_pad != M:
        x_p = jnp.pad(x_p, ((0, M_pad - M), (0, 0)))
    w1_c = w1.astype(matmul_dtype)
    w2_c = w2.astype(matmul_dtype)
    b2_p = b2.astype(jnp.float32)
    if O_pad != O:
        w2_c = jnp.pad(w2_c, ((0, 0), (0, O_pad - O)))
        b2_p = jnp.pad(b2_p, ((0, O_pad - O),))
    b1_2d = b1.astype(jnp.float32).reshape(1, P)
    b2_2d = b2_p.reshape(1, O_pad)

    grid = (M_pad // tm, O_pad // tn)
    num_row_tiles = grid[0]

    # Advisory scheduling hint for XLA.
    flops = 2 * M_pad * (H * P + P * O_pad)
    bytes_accessed = (
        x_p.size * x_p.dtype.itemsize
        + w1_c.size * w1_c.dtype.itemsize
        + b1_2d.size * 4
        + b2_2d.size * 4
        + w2_c.size * w2_c.dtype.itemsize * num_row_tiles  # W2 streamed per row tile
        + M_pad * O_pad * 4
    )
    cost = pl.CostEstimate(flops=flops, transcendentals=M_pad * P,
                           bytes_accessed=bytes_accessed)

    out = pl.pallas_call(
        prefix_mlp_kernel,
        out_shape=jax.ShapeDtypeStruct((M_pad, O_pad), jnp.float32),
        grid_spec=pltpu.PrefetchScalarGridSpec(
            num_scalar_prefetch=0,
            grid=grid,
            in_specs=[
                pl.BlockSpec((tm, H), lambda i, j: (i, 0)),    # x, tiled by rows
                pl.BlockSpec((H, P), lambda i, j: (0, 0)),     # W1 (resident)
                pl.BlockSpec((1, P), lambda i, j: (0, 0)),     # b1 (resident)
                pl.BlockSpec((P, tn), lambda i, j: (0, j)),    # W2, tiled along O
                pl.BlockSpec((1, tn), lambda i, j: (0, j)),    # b2, tiled along O
            ],
            out_specs=pl.BlockSpec((tm, tn), lambda i, j: (i, j)),
            scratch_shapes=[pltpu.VMEM((tm, P), jnp.float32)],  # cached tanh activation
        ),
        compiler_params=pltpu.CompilerParams(
            # O axis must be sequential ("arbitrary") so the h scratch is valid
            # across all O tiles of a row block; rows are independent.
            dimension_semantics=("parallel", "arbitrary"),
            vmem_limit_bytes=48 * 1024 * 1024,
        ),
        cost_estimate=cost,
    )(x_p, w1_c, b1_2d, w2_c, b2_2d)

    return out[:M, :O]


def prefix_encoder_forward(prefix, params, config):
    """Mirrors PrefixEncoder.forward.  prefix: (B, S) int32 of token ids."""
    B, S = prefix.shape
    if config["prefix_projection"]:
        # Embedding gather = glue (plain JAX), MLP hot path = Pallas kernel.
        tokens = jnp.take(params["embedding"], prefix, axis=0)        # (B, S, H)
        H = tokens.shape[-1]
        x2d = tokens.reshape(B * S, H)
        out2d = prefix_encoder_mlp(
            x2d, params["w1"], params["b1"], params["w2"], params["b2"])
        return out2d.reshape(B, S, -1)
    else:
        # Embedding-only branch is a pure gather; no matmul hot path -> plain JAX.
        return jnp.take(params["embedding"], prefix, axis=0)


def make_params(key, config):
    H = config["hidden_size"]
    P = config["prefix_hidden_size"]
    L = config["num_hidden_layers"]
    S = config["pre_seq_len"]
    O = 2 * L * H
    k0, k1, k2, k3, k4 = jax.random.split(key, 5)
    if config["prefix_projection"]:
        return {
            "embedding": jax.random.normal(k0, (S, H), jnp.float32) * 0.02,
            # weights stored as (in, out) == PyTorch nn.Linear.weight.T
            "w1": jax.random.normal(k1, (H, P), jnp.float32) * 0.02,
            "b1": jax.random.normal(k2, (P,), jnp.float32) * 0.02,
            "w2": jax.random.normal(k3, (P, O), jnp.float32) * 0.02,
            "b2": jax.random.normal(k4, (O,), jnp.float32) * 0.02,
        }
    else:
        return {"embedding": jax.random.normal(k0, (S, O), jnp.float32) * 0.02}


def _reference(prefix, params):
    tok = jnp.take(params["embedding"], prefix, axis=0)
    return jnp.tanh(tok @ params["w1"] + params["b1"]) @ params["w2"] + params["b2"]


if __name__ == "__main__":
    config = {
        "prefix_projection": True,
        "pre_seq_len": 8,
        "hidden_size": 32,
        "prefix_hidden_size": 64,
        "num_hidden_layers": 2,   # -> output dim 2*2*32 = 128
    }
    key = jax.random.PRNGKey(0)
    pkey, ikey, ikey2 = jax.random.split(key, 3)
    params = make_params(pkey, config)

    # Case 1: standard (B, pre_seq_len) prefix.
    B, S = 2, config["pre_seq_len"]
    prefix = jax.random.randint(ikey, (B, S), 0, config["pre_seq_len"], jnp.int32)
    out = jax.block_until_ready(prefix_encoder_forward(prefix, params, config))
    ref = _reference(prefix, params)
    expected_shape = (B, S, 2 * config["num_hidden_layers"] * config["hidden_size"])
    assert out.shape == expected_shape, out.shape
    # bf16 matmul inputs -> loosened tolerance vs. f32 reference.
    assert jnp.allclose(out, ref, atol=1e-3, rtol=1e-2), float(
        jnp.max(jnp.abs(out - ref)))

    # Case 2: ragged row count (M = 1*5 is not a multiple of 8) exercises padding.
    prefix2 = jax.random.randint(ikey2, (1, 5), 0, config["pre_seq_len"], jnp.int32)
    out2 = jax.block_until_ready(prefix_encoder_forward(prefix2, params, config))
    ref2 = _reference(prefix2, params)
    assert out2.shape == (1, 5, expected_shape[-1]), out2.shape
    assert jnp.allclose(out2, ref2, atol=1e-3, rtol=1e-2), float(
        jnp.max(jnp.abs(out2 - ref2)))

    print("KERNEL_OK")
</pallas_src>

<mosaic_0001>
module attributes {stable_mosaic.version = 11 : i64} {
  func.func @prefix_mlp_kernel(%arg0: i32, %arg1: i32, %arg2: memref<16x32xbf16, #tpu.memory_space<vmem>>, %arg3: memref<32x64xbf16, #tpu.memory_space<vmem>>, %arg4: memref<1x64xf32, #tpu.memory_space<vmem>>, %arg5: memref<64x128xbf16, #tpu.memory_space<vmem>>, %arg6: memref<1x128xf32, #tpu.memory_space<vmem>>, %arg7: memref<16x128xf32, #tpu.memory_space<vmem>>, %arg8: memref<16x64xf32, #tpu.memory_space<vmem>>) attributes {dimension_semantics = [#tpu.dimension_semantics<parallel>, #tpu.dimension_semantics<arbitrary>], iteration_bounds = array<i64: 1, 1>, scalar_prefetch = 0 : i64, scratch_operands = 1 : i64, tpu.core_type = #tpu.core_type<tc>, window_params = [{transform_indices = @transform_0, window_bounds = array<i64: 16, 32>}, {pipeline_mode = #tpu.pipeline_mode<synchronous>, transform_indices = @transform_1, window_bounds = array<i64: 32, 64>}, {pipeline_mode = #tpu.pipeline_mode<synchronous>, transform_indices = @transform_2, window_bounds = array<i64: 1, 64>}, {transform_indices = @transform_3, window_bounds = array<i64: 64, 128>}, {transform_indices = @transform_4, window_bounds = array<i64: 1, 128>}, {transform_indices = @transform_5, window_bounds = array<i64: 16, 128>}]} {
    %c0_i32 = arith.constant 0 : i32
    %0 = arith.cmpi eq, %arg1, %c0_i32 : i32
    %1 = arith.extui %0 : i1 to i32
    %c0_i32_0 = arith.constant 0 : i32
    %2 = arith.cmpi ne, %1, %c0_i32_0 : i32
    scf.if %2 {
      %c0_8 = arith.constant 0 : index
      %c0_9 = arith.constant 0 : index
      %11 = vector.load %arg2[%c0_8, %c0_9] : memref<16x32xbf16, #tpu.memory_space<vmem>>, vector<16x32xbf16>
      %c0_10 = arith.constant 0 : index
      %c0_11 = arith.constant 0 : index
      %12 = vector.load %arg3[%c0_10, %c0_11] : memref<32x64xbf16, #tpu.memory_space<vmem>>, vector<32x64xbf16>
      %cst_12 = arith.constant dense<0.000000e+00> : vector<16x64xf32>
      %13 = tpu.matmul %11, %12, %cst_12 {dimension_numbers = #tpu.dot_dimension_numbers<[1], [0], [0], [1], [0, 0, 1, 1], [], []>} : vector<16x32xbf16>, vector<32x64xbf16>, vector<16x64xf32> -> vector<16x64xf32>
      %c0_13 = arith.constant 0 : index
      %c0_14 = arith.constant 0 : index
      %14 = vector.load %arg4[%c0_13, %c0_14] : memref<1x64xf32, #tpu.memory_space<vmem>>, vector<1x64xf32>
      %15 = vector.broadcast %14 : vector<1x64xf32> to vector<16x64xf32>
      %16 = arith.addf %13, %15 : vector<16x64xf32>
      %17 = math.tanh %16 : vector<16x64xf32>
      %c0_15 = arith.constant 0 : index
      %c0_16 = arith.constant 0 : index
      %18 = vector.load %arg8[%c0_15, %c0_16] : memref<16x64xf32, #tpu.memory_space<vmem>>, vector<16x64xf32>
      tpu.vector_store %arg8[%c0_15, %c0_16], %17 {strides = array<i32>} : memref<16x64xf32, #tpu.memory_space<vmem>>, vector<16x64xf32>,
    } else {
    }
    %c0 = arith.constant 0 : index
    %c0_1 = arith.constant 0 : index
    %3 = vector.load %arg8[%c0, %c0_1] : memref<16x64xf32, #tpu.memory_space<vmem>>, vector<16x64xf32>
    %4 = arith.truncf %3 : vector<16x64xf32> to vector<16x64xbf16>
    %c0_2 = arith.constant 0 : index
    %c0_3 = arith.constant 0 : index
    %5 = vector.load %arg5[%c0_2, %c0_3] : memref<64x128xbf16, #tpu.memory_space<vmem>>, vector<64x128xbf16>
    %cst = arith.constant dense<0.000000e+00> : vector<16x128xf32>
    %6 = tpu.matmul %4, %5, %cst {dimension_numbers = #tpu.dot_dimension_numbers<[1], [0], [0], [1], [0, 0, 1, 1], [], []>} : vector<16x64xbf16>, vector<64x128xbf16>, vector<16x128xf32> -> vector<16x128xf32>
    %c0_4 = arith.constant 0 : index
    %c0_5 = arith.constant 0 : index
    %7 = vector.load %arg6[%c0_4, %c0_5] : memref<1x128xf32, #tpu.memory_space<vmem>>, vector<1x128xf32>
    %8 = vector.broadcast %7 : vector<1x128xf32> to vector<16x128xf32>
    %9 = arith.addf %6, %8 : vector<16x128xf32>
    %c0_6 = arith.constant 0 : index
    %c0_7 = arith.constant 0 : index
    %10 = vector.load %arg7[%c0_6, %c0_7] : memref<16x128xf32, #tpu.memory_space<vmem>>, vector<16x128xf32>
    tpu.vector_store %arg7[%c0_6, %c0_7], %9 {strides = array<i32>} : memref<16x128xf32, #tpu.memory_space<vmem>>, vector<16x128xf32>,
    return
  }
  func.func @transform_0(%arg0: i32, %arg1: i32) -> (i32, i32) {
    %c0_i32 = arith.constant 0 : i32
    %c0_i32_0 = arith.constant 0 : i32
    return %arg0, %c0_i32 : i32, i32
  }
  func.func @transform_1(%arg0: i32, %arg1: i32) -> (i32, i32) {
    %c0_i32 = arith.constant 0 : i32
    %c0_i32_0 = arith.constant 0 : i32
    %c0_i32_1 = arith.constant 0 : i32
    return %c0_i32, %c0_i32_0 : i32, i32
  }
  func.func @transform_2(%arg0: i32, %arg1: i32) -> (i32, i32) {
    %c0_i32 = arith.constant 0 : i32
    %c0_i32_0 = arith.constant 0 : i32
    %c0_i32_1 = arith.constant 0 : i32
    return %c0_i32, %c0_i32_0 : i32, i32
  }
  func.func @transform_3(%arg0: i32, %arg1: i32) -> (i32, i32) {
    %c0_i32 = arith.constant 0 : i32
    %c0_i32_0 = arith.constant 0 : i32
    return %c0_i32, %arg1 : i32, i32
  }
  func.func @transform_4(%arg0: i32, %arg1: i32) -> (i32, i32) {
    %c0_i32 = arith.constant 0 : i32
    %c0_i32_0 = arith.constant 0 : i32
    return %c0_i32, %arg1 : i32, i32
  }
  func.func @transform_5(%arg0: i32, %arg1: i32) -> (i32, i32) {
    %c0_i32 = arith.constant 0 : i32
    return %arg0, %arg1 : i32, i32
  }
}

</mosaic_0001>

<bundles_post_ra>
// kernel: tpu_custom_call.1
= control target key start
LH: loop header
LB: loop body
LE: loop exit
PB: predicated region body
PF: predicated region fallthrough
CT: control target
= control target key end

     0   :  { %10 = vsyncpa [#allocation4], 0  ;;  %s518_s0 = inlined_call_operand.hbm [shape: bf16[16,32], index: 0, kind: input, shape index: {}]   ;;  %s519_s1 = inlined_call_operand.hbm [shape: bf16[32,64], index: 1, kind: input, shape index: {}]   ;;  %s520_s2 = inlined_call_operand.vmem [shape: f32[1,64], index: 2, kind: input, shape index: {}]   ;;  %s521_s3 = inlined_call_operand.hbm [shape: bf16[64,128], index: 3, kind: input, shape index: {}]   ;;  %s522_s4 = inlined_call_operand.vmem [shape: f32[1,128], index: 4, kind: input, shape index: {}]   ;;  %s523_s5 = inlined_call_operand.hbm [shape: f32[16,128], index: 5, kind: output, shape index: {}]  }
   0x1   :  { %11 = vsyncpa [#allocation7], 0 }
   0x2   :  { %12 = vsyncpa [#allocation5], 0  ;;  %s408_s18 = smov [#allocation6]   ;;  %s409_s20 = smov [#allocation3]  }
   0x3   :  { %s30_s19 = sshll.u32 %s408_s18, 4  ;;  %s18_s21 = sshll.u32 %s409_s20, 4  ;;  %s31_s19 = int_to_ptr.vmem [resolvable:$true] %s30_s19  ;;  %s448_s21 = int_to_ptr.vmem [resolvable:$true] %s18_s21 }
   0x4   :  { %s314_s24 = scalar_lea.hbm %s519_s1, 256 }
   0x5   :  { %p315_p0 = scmp.ne.s32.totalorder %s519_s1, %s314_s24  ;;  %p318_p1 = scmp.lt.u32.totalorder %s314_s24, %s519_s1 }
   0x7   :  { %p320_p2 = pnand %p318_p1, %p315_p0 }
   0x9   :  { %323 = shalt.err (!%p320_p2)
}
   0xa   :  { %s324_s29 = scalar_lea.vmem %s31_s19, 256  ;;  %p329_p4 = scmp.lt.s32.totalorder %s31_s19, %s31_s19 }
   0xb   :  { %p325_p3 = scmp.ne.s32.totalorder %s31_s19, %s324_s29  ;;  %p330_p5 = scmp.lt.s32.totalorder %s324_s29, %s324_s29 }
   0xd   :  { %p331_p6 = por %p330_p5, %p329_p4 }
   0xf   :  { %p332_p7 = pnand %p331_p6, %p325_p3 }
  0x11   :  { %335 = shalt.err (!%p332_p7)
}
  0x12   :  { %s410_s30 = smov 64   ;;  %s411_s6 = smov 4  }
  0x13   :  { %36 = dma.hbm_to_vmem [thread:$0]  %s519_s1, 256, %s31_s19, [#allocation7], %s410_s30, %s410_s30, %s411_s6  }
  0x14   :  { %s336_s11 = scalar_lea.hbm %s518_s0, 128 }
  0x15   :  { %p337_p8 = scmp.ne.s32.totalorder %s518_s0, %s336_s11  ;;  %p340_p9 = scmp.lt.u32.totalorder %s336_s11, %s518_s0 }
  0x17   :  { %p342_p10 = pnand %p340_p9, %p337_p8 }
  0x19   :  { %345 = shalt.err (!%p342_p10)
}
  0x1a   :  { %s346_s16 = scalar_lea.vmem %s448_s21, 128  ;;  %p351_p12 = scmp.lt.s32.totalorder %s448_s21, %s448_s21 }
  0x1b   :  { %p347_p11 = scmp.ne.s32.totalorder %s448_s21, %s346_s16  ;;  %p352_p13 = scmp.lt.s32.totalorder %s346_s16, %s346_s16 }
  0x1d   :  { %p353_p0 = por %p352_p13, %p351_p12 }
  0x1f   :  { %p354_p1 = pnand %p353_p0, %p347_p11 }
  0x21   :  { %357 = shalt.err (!%p354_p1)
}
  0x22   :  { %24 = dma.hbm_to_vmem [thread:$0]  %s518_s0, 128, %s448_s21, [#allocation4], %s410_s30, %s410_s30, %s411_s6  }
  0x23   :  { %s412_s18 = smov [#allocation8]   ;;  %s358_s23 = scalar_lea.hbm %s521_s3, 512 }
  0x24   :  { %s44_s19 = sshll.u32 %s412_s18, 4  ;;  %p359_p2 = scmp.ne.s32.totalorder %s521_s3, %s358_s23  ;;  %s45_s19 = int_to_ptr.vmem [resolvable:$true] %s44_s19 }
  0x25   :  { %p362_p3 = scmp.lt.u32.totalorder %s358_s23, %s521_s3 }
  0x27   :  { %p364_p4 = pnand %p362_p3, %p359_p2 }
  0x29   :  { %367 = shalt.err (!%p364_p4)
}
  0x2a   :  { %s368_s28 = scalar_lea.vmem %s45_s19, 512  ;;  %p373_p6 = scmp.lt.s32.totalorder %s45_s19, %s45_s19 }
  0x2b   :  { %p369_p5 = scmp.ne.s32.totalorder %s45_s19, %s368_s28  ;;  %p374_p7 = scmp.lt.s32.totalorder %s368_s28, %s368_s28 }
  0x2d   :  { %p375_p8 = por %p374_p7, %p373_p6 }
  0x2f   :  { %p376_p9 = pnand %p375_p8, %p369_p5 }
  0x31   :  { %379 = shalt.err (!%p376_p9)
}
  0x32   :  { %50 = dma.hbm_to_vmem [thread:$0]  %s521_s3, 512, %s45_s19, [#allocation7], %s410_s30, %s410_s30, %s411_s6  }
  0x33   :  { %402 = dma.done.wait [#allocation4], 128  }
  0x34   :  { %403 = vsyncadd [#allocation4], 4294967168 }
  0x35   :  { %404 = dma.done.wait [#allocation7], 768  }
  0x36   :  { %405 = vsyncadd [#allocation7], 4294966528  ;;  %v413_v0 = vmov 0.0   ;;  %vm414_vm0 = vmmov 0   ;;  %v303_v1 = vld [vmem:[#allocation6] sm:$0xff]   ;;  %v304_v2 = vld [vmem:[#allocation6 + $0x8] sm:$0xff]  }
  0x37   :  { %273 = vmatprep.subr.bf16.mxu0 %v413_v0  ;;  %277 = vmatprep.mubr.msk.bf16.mxu0 %vm414_vm0, %v413_v0  ;;  %v305_v3 = vld [vmem:[#allocation3] sm:$0xff]   ;;  %vm97_vm1 = vcmask 261120   ;;  %v306_v4 = vld [vmem:[#allocation8] sm:$0xff]   ;;  %v308_v6 = vld [vmem:[#allocation8 + $0x10] sm:$0xff]   ;;  %vm144_vm2 = vcmask 523264  }
  0x38   :  { %281 = vmatprep.subr.bf16.mxu1 %v413_v0  ;;  %289 = vmatprep.mubr.msk.bf16.mxu1 %vm414_vm0, %v413_v0  ;;  %v307_v5 = vld [vmem:[#allocation8 + $0x8] sm:$0xff]   ;;  %v309_v7 = vld [vmem:[#allocation8 + $0x18] sm:$0xff]  }
  0x39   :  { %274 = vmatpush3.bf16.msra.mxu0 %v303_v1  ;;  %282 = vmatpush3.bf16.msra.mxu1 %v306_v4  ;;  %v254_v8 = vld [vmem:[%s520_s2] ss:$0 sm:$0xff]  ;;  %s415_s2 = smov [#allocation9]  }
  0x3a   :  { %275 = vmatprep.subr.bf16.mxu0 %v413_v0  ;;  %283 = vmatprep.subr.bf16.mxu1 %v413_v0  ;;  %v259_v20 = vld [vmem:[%s522_s4] ss:$0 sm:$0xff]  ;;  %s241_s7 = sshll.u32 %s415_s2, 4  ;;  %s242_s7 = int_to_ptr.vmem [resolvable:$true] %s241_s7 }
  0x3b   :  { %s380_s8 = scalar_lea.vmem %s242_s7, 256  ;;  %p385_p11 = scmp.lt.s32.totalorder %s242_s7, %s242_s7 }
  0x3c   :  { %p381_p10 = scmp.ne.s32.totalorder %s242_s7, %s380_s8  ;;  %p386_p12 = scmp.lt.s32.totalorder %s380_s8, %s380_s8 }
  0x3d   :  { %276 = vmatpush3.bf16.msra.mxu0 %v304_v2  ;;  %284 = vmatpush3.bf16.msra.mxu1 %v307_v5 }
  0x3e   :  { %285 = vmatprep.subr.bf16.mxu1 %v413_v0  ;;  %p387_p13 = por %p386_p12, %p385_p11 }
  0x40   :  { %278 = vmatmul.mubr.msk.bf16.vlgmr.msra.gmra.mrb[0].mxu0 %vm97_vm1, %v305_v3  ;;  %p388_p0 = pnand %p387_p13, %p381_p10 }
  0x41   :  { %286 = vmatpush3.bf16.msra.mxu1 %v308_v6 }
  0x42   :  { %287 = vmatprep.subr.bf16.mxu1 %v413_v0 }
  0x45   :  { %288 = vmatpush3.bf16.msra.mxu1 %v309_v7 }
 0x113   :  { %v135_v9 = vpop.f32.mrb[0].mxu0 }
 0x114   :  { %v136_v10 = vadd.f32 %v254_v8, %v135_v9  ;;  %v279_v11 = vpop.f32.mrb[1].mxu0 }
 0x115   :  { %v138_v12 = vpop.f32.mrb[2].mxu0 }
 0x116   :  { %310 = vtanh.f32 %v136_v10  ;;  %v139_v13 = vadd.f32 %v254_v8, %v138_v12  ;;  %v280_v14 = vpop.f32.mrb[3].mxu0 }
 0x118   :  { %312 = vtanh.f32 %v139_v13 }
 0x120   :  { %v311_v15 = vpop.eup %310 }
 0x121   :  { %145 = vst.msk [vmem:[#allocation2] sm:$0xff] %vm144_vm2, %v311_v15 }
 0x122   :  { %v313_v16 = vpop.eup %312 }
 0x123   :  { %146 = vst.msk [vmem:[#allocation2 + $0x8] sm:$0xff] %vm144_vm2, %v313_v16 }
 0x128   :  { %v147_v17 = vld [vmem:[#allocation2] sm:$0xff] }
 0x12a   :  { %v148_v18 = vld [vmem:[#allocation2 + $0x8] sm:$0xff] }
 0x12b   :  { %v149_v19 = vpack.c.bf16 %v148_v18, %v147_v17 }
 0x12d   :  { %290 = vmatmul.mubr.msk.bf16.vlgmr.msra.gmra.mrb[0].mxu1 %vm144_vm2, %v149_v19 }
 0x200   :  { %v227_v21 = vpop.f32.mrb[0].mxu1 }
 0x201   :  { %v228_v22 = vadd.f32 %v259_v20, %v227_v21  ;;  %v291_v23 = vpop.f32.mrb[1].mxu1 }
 0x202   :  { %v230_v24 = vpop.f32.mrb[2].mxu1 }
 0x203   :  { %234 = vst [vmem:[#allocation9] sm:$0xff] %v228_v22  ;;  %v231_v25 = vadd.f32 %v259_v20, %v230_v24  ;;  %v292_v26 = vpop.f32.mrb[3].mxu1 }
 0x205   :  { %235 = vst [vmem:[#allocation9 + $0x8] sm:$0xff] %v231_v25 }
 0x206   :  { %391 = shalt.err (!%p388_p0)
}
 0x207   :  { %s392_s10 = scalar_lea.hbm %s523_s5, 256 }
 0x208   :  { %p393_p1 = scmp.ne.s32.totalorder %s523_s5, %s392_s10  ;;  %p396_p2 = scmp.lt.u32.totalorder %s392_s10, %s523_s5 }
 0x20a   :  { %p398_p3 = pnand %p396_p2, %p393_p1 }
 0x20c   :  { %401 = shalt.err (!%p398_p3)
}
 0x20d   :  { %s416_s15 = smov 128   ;;  %s417_s16 = smov 8  }
 0x20e   :  { %247 = dma.vmem_to_hbm [thread:$0]  %s242_s7, 256, %s523_s5, [#allocation5], %s416_s15, %s416_s15, %s417_s16  }
 0x20f   :  { %406 = dma.done.wait [#allocation5], 256  }
 0x210   :  { %407 = vsyncadd [#allocation5], 4294967040 }
 0x211   :  { %251 = vsyncpa [#allocation4], 1 }
 0x212   :  { %252 = vsyncpa [#allocation7], 1 }
 0x213   :  { %253 = vsyncpa [#allocation5], 1 }

</bundles_post_ra>
